<compile_context>
chip_gen: v6e
topology: v6e:2x2x1
jax: 0.10.0
libtpu: 0.0.40
codegen_flags: <defaults>
</compile_context>

<pallas_src>
import jax
import jax.numpy as jnp
from jax.experimental import pallas as pl
from jax.experimental.pallas import tpu as pltpu

NEG_SLOPE = 0.01                     # nn.LeakyReLU() default
BN_EPS = 1e-5                        # nn.BatchNorm1d default
VMEM_LIMIT = 32 * 1024 * 1024
TILE_VMEM_BUDGET = 12 * 1024 * 1024  # double-buffered per-step tile budget


def _round_up(x, m):
    return (x + m - 1) // m * m


def _pick_row_tile(packed_n, bytes_per_row):
    """Largest power-of-two row tile (<=1024) whose double-buffered tiles fit
    the VMEM budget and whose padding overhead is <= ~12.5% of the real rows."""
    t = 1024
    while t > 8 and 2 * t * bytes_per_row > TILE_VMEM_BUDGET:
        t //= 2
    while t > 8 and (_round_up(packed_n, t) - packed_n) * 8 > packed_n:
        t //= 2
    return t


# ----------------------------------------------------------------------------
# Pass 1 kernels: bf16 MXU matmul + LeakyReLU + BN partial sums
# ----------------------------------------------------------------------------
def conv_act_stats_store_kernel(a_ref, w_ref, y_ref, sum_ref, sumsq_ref):
    """Stores the bf16 activated intermediate and accumulates BN stats."""
    @pl.when(pl.program_id(0) == 0)
    def _():
        sum_ref[...] = jnp.zeros_like(sum_ref)
        sumsq_ref[...] = jnp.zeros_like(sumsq_ref)

    # bf16 x bf16 -> f32 accumulate on the MXU
    y = jnp.dot(a_ref[...], w_ref[...], preferred_element_type=jnp.float32)
    y = jnp.where(y >= 0, y, NEG_SLOPE * y)           # LeakyReLU (before BN)
    y_bf16 = y.astype(y_ref.dtype)
    y_ref[...] = y_bf16                               # lane-dense bf16 store

    # stats from the bf16-rounded values the normalize pass will actually see,
    # so the layer output really has (approximately) zero mean / unit variance
    y32 = y_bf16.astype(jnp.float32)
    sum_ref[...] += jnp.broadcast_to(jnp.sum(y32, axis=0), sum_ref.shape)
    sumsq_ref[...] += jnp.broadcast_to(jnp.sum(y32 * y32, axis=0), sumsq_ref.shape)


def conv_act_stats_kernel(a_ref, w_ref, sum_ref, sumsq_ref):
    """Stats only (no intermediate stored) — pairs with the recompute pass."""
    @pl.when(pl.program_id(0) == 0)
    def _():
        sum_ref[...] = jnp.zeros_like(sum_ref)
        sumsq_ref[...] = jnp.zeros_like(sumsq_ref)

    y = jnp.dot(a_ref[...], w_ref[...], preferred_element_type=jnp.float32)
    y = jnp.where(y >= 0, y, NEG_SLOPE * y)
    sum_ref[...] += jnp.broadcast_to(jnp.sum(y, axis=0), sum_ref.shape)
    sumsq_ref[...] += jnp.broadcast_to(jnp.sum(y * y, axis=0), sumsq_ref.shape)


# ----------------------------------------------------------------------------
# Pass 2 kernels: BatchNorm1d normalization folded to one FMA (gamma=1, beta=0)
# ----------------------------------------------------------------------------
def bn_norm_kernel(y_ref, scale_ref, bias_ref, o_ref):
    o_ref[...] = y_ref[...].astype(jnp.float32) * scale_ref[...] + bias_ref[...]


def conv_act_bn_kernel(a_ref, w_ref, scale_ref, bias_ref, o_ref):
    y = jnp.dot(a_ref[...], w_ref[...], preferred_element_type=jnp.float32)
    y = jnp.where(y >= 0, y, NEG_SLOPE * y)
    o_ref[...] = y * scale_ref[...] + bias_ref[...]


# ----------------------------------------------------------------------------
# Wrapper: ConvLayer.forward
# ----------------------------------------------------------------------------
def conv_layer_forward(features, indices, weight, spatial_shape, batch_size,
                       ksize=3, dilation=1):
    N, C_in = features.shape
    K3 = ksize ** 3
    C_out = weight.shape[-1]
    D, H, W = spatial_shape

    # ---- packing geometry ---------------------------------------------------
    # Pack P consecutive voxel rows into one 128-lane row so every load/store
    # is a full vreg even when C_out < 128.
    if C_out % 128 == 0:
        P, Cp = 1, C_out
    elif 128 % C_out == 0:
        P, Cp = 128 // C_out, C_out
    else:
        P, Cp = 1, _round_up(C_out, 128)
    Kc = _round_up(K3 * C_in, 128)        # lane-padded contraction width
    Wp = P * Cp                           # packed output width (mult. of 128)

    # ---- glue: coordinate -> row lookup volume (submanifold rulebook) -------
    # NOTE: duplicate voxel coordinates keep only the last row (same as before).
    b = indices[:, 0]
    z = indices[:, 1]
    y = indices[:, 2]
    x = indices[:, 3]
    vol = -jnp.ones((batch_size, D, H, W), dtype=jnp.int32)
    vol = vol.at[b, z, y, x].set(jnp.arange(N, dtype=jnp.int32))

    # ---- glue: im2col gather over the K^3 neighborhood (missing -> 0) -------
    # Built directly in bf16: no full-size f32 [rows, Kc] copy ever hits HBM.
    feats_bf16 = features.astype(jnp.bfloat16)
    half = ksize // 2
    cols = []
    for dz in range(-half, half + 1):
        for dy in range(-half, half + 1):
            for dx in range(-half, half + 1):
                nz = z + dz * dilation
                ny = y + dy * dilation
                nx = x + dx * dilation
                valid = (nz >= 0) & (nz < D) & (ny >= 0) & (ny < H) & \
                        (nx >= 0) & (nx < W)
                nb = vol[b,
                         jnp.clip(nz, 0, D - 1),
                         jnp.clip(ny, 0, H - 1),
                         jnp.clip(nx, 0, W - 1)]
                nb = jnp.where(valid, nb, -1)
                f = jnp.where((nb >= 0)[:, None],
                              feats_bf16[jnp.clip(nb, 0, N - 1)],
                              0.0)
                cols.append(f)
    if Kc > K3 * C_in:                                   # lane-pad contraction
        cols.append(jnp.zeros((N, Kc - K3 * C_in), jnp.bfloat16))
    a = jnp.concatenate(cols, axis=1)                    # [N, Kc] bf16

    # ---- adaptive row tiling / padding (zero rows add 0 to the BN sums) -----
    packed_n = -(-N // P)                                # ceil(N / P)
    row_bytes = P * Kc * 2 + Wp * 2 + Wp * 4             # A + y + out per row
    TMR = _pick_row_tile(packed_n, row_bytes)
    packed_rows = _round_up(packed_n, TMR)
    rows_total = packed_rows * P
    a = jnp.pad(a, ((0, rows_total - N), (0, 0)))
    a_packed = a.reshape(packed_rows, P * Kc)            # free row-major pack

    # block-diagonal weights: [x_0|..|x_{P-1}] @ Wb = [y_0|..|y_{P-1}]
    w_flat = weight.reshape(K3 * C_in, C_out).astype(jnp.float32)
    w_pad = jnp.zeros((Kc, Cp), jnp.float32).at[:K3 * C_in, :C_out].set(w_flat)
    w_block = jnp.kron(jnp.eye(P, dtype=jnp.float32), w_pad).astype(jnp.bfloat16)

    n_tiles = packed_rows // TMR
    # Recompute the conv in the normalize pass only when re-reading the A tile
    # costs less HBM than round-tripping a bf16 y intermediate (Kc <= 2*Cp).
    recompute = (P * Kc) <= 2 * Wp

    a_spec = pl.BlockSpec((TMR, P * Kc), lambda i: (i, 0))
    w_spec = pl.BlockSpec((P * Kc, Wp), lambda i: (0, 0))
    stat_spec = pl.BlockSpec((8, Wp), lambda i: (0, 0))

    # ---- pass 1: matmul + LeakyReLU (+ optional bf16 store) + BN statistics -
    if recompute:
        sums, sumsqs = pl.pallas_call(
            conv_act_stats_kernel,
            out_shape=(jax.ShapeDtypeStruct((8, Wp), jnp.float32),
                       jax.ShapeDtypeStruct((8, Wp), jnp.float32)),
            grid_spec=pltpu.PrefetchScalarGridSpec(
                num_scalar_prefetch=0,
                grid=(n_tiles,),
                in_specs=[a_spec, w_spec],
                out_specs=[stat_spec, stat_spec]),
            compiler_params=pltpu.CompilerParams(
                dimension_semantics=("arbitrary",),
                vmem_limit_bytes=VMEM_LIMIT),
        )(a_packed, w_block)
        y_packed = None
    else:
        y_packed, sums, sumsqs = pl.pallas_call(
            conv_act_stats_store_kernel,
            out_shape=(jax.ShapeDtypeStruct((packed_rows, Wp), jnp.bfloat16),
                       jax.ShapeDtypeStruct((8, Wp), jnp.float32),
                       jax.ShapeDtypeStruct((8, Wp), jnp.float32)),
            grid_spec=pltpu.PrefetchScalarGridSpec(
                num_scalar_prefetch=0,
                grid=(n_tiles,),
                in_specs=[a_spec, w_spec],
                out_specs=[pl.BlockSpec((TMR, Wp), lambda i: (i, 0)),
                           stat_spec, stat_spec]),
            compiler_params=pltpu.CompilerParams(
                dimension_semantics=("arbitrary",),
                vmem_limit_bytes=VMEM_LIMIT),
        )(a_packed, w_block)

    # ---- tiny per-channel scalar math (training-mode BN batch statistics) ---
    ch_sum = sums[0].reshape(P, Cp).sum(axis=0)          # [Cp]
    ch_sumsq = sumsqs[0].reshape(P, Cp).sum(axis=0)      # [Cp]
    n_f = jnp.float32(N)
    mean = ch_sum / n_f
    # TODO(synk): E[y^2]-E[y]^2 in f32 can cancel when |mean| >> std; switch to
    # shifted / Welford-style tile sums if that regime shows up.
    var = jnp.maximum(ch_sumsq / n_f - mean * mean, 0.0)  # biased variance
    inv_std = 1.0 / jnp.sqrt(var + BN_EPS)
    scale = jnp.tile(inv_std, P)[None, :]                 # gamma = 1
    bias = jnp.tile(-mean * inv_std, P)[None, :]          # beta = 0

    sb_spec = pl.BlockSpec((1, Wp), lambda i: (0, 0))

    # ---- pass 2: normalize (lane-dense tiles) --------------------------------
    if recompute:
        out_packed = pl.pallas_call(
            conv_act_bn_kernel,
            out_shape=jax.ShapeDtypeStruct((packed_rows, Wp), jnp.float32),
            grid_spec=pltpu.PrefetchScalarGridSpec(
                num_scalar_prefetch=0,
                grid=(n_tiles,),
                in_specs=[a_spec, w_spec, sb_spec, sb_spec],
                out_specs=pl.BlockSpec((TMR, Wp), lambda i: (i, 0))),
            compiler_params=pltpu.CompilerParams(
                dimension_semantics=("parallel",),
                vmem_limit_bytes=VMEM_LIMIT),
        )(a_packed, w_block, scale, bias)
    else:
        # normalize-only pass is much lighter per row -> grow its tile further
        tmr2 = TMR
        while (tmr2 < 4096 and packed_rows % (tmr2 * 2) == 0
               and 2 * (tmr2 * 2) * Wp * 6 <= TILE_VMEM_BUDGET):
            tmr2 *= 2
        out_packed = pl.pallas_call(
            bn_norm_kernel,
            out_shape=jax.ShapeDtypeStruct((packed_rows, Wp), jnp.float32),
            grid_spec=pltpu.PrefetchScalarGridSpec(
                num_scalar_prefetch=0,
                grid=(packed_rows // tmr2,),
                in_specs=[pl.BlockSpec((tmr2, Wp), lambda i: (i, 0)),
                          sb_spec, sb_spec],
                out_specs=pl.BlockSpec((tmr2, Wp), lambda i: (i, 0))),
            compiler_params=pltpu.CompilerParams(
                dimension_semantics=("parallel",),
                vmem_limit_bytes=VMEM_LIMIT),
        )(y_packed, scale, bias)

    # unpack (free row-major reshape) and drop padding
    return out_packed.reshape(rows_total, Cp)[:N, :C_out]   # [N, C_out]


# ----------------------------------------------------------------------------
# Pure-JAX f32 reference (same math) for a sanity check
# ----------------------------------------------------------------------------
def _reference(features, indices, weight, spatial_shape, batch_size):
    N, C_in = features.shape
    D, H, W = spatial_shape
    b, z, y, x = indices[:, 0], indices[:, 1], indices[:, 2], indices[:, 3]
    vol = -jnp.ones((batch_size, D, H, W), dtype=jnp.int32)
    vol = vol.at[b, z, y, x].set(jnp.arange(N, dtype=jnp.int32))
    cols = []
    for dz in (-1, 0, 1):
        for dy in (-1, 0, 1):
            for dx in (-1, 0, 1):
                nz, ny, nx = z + dz, y + dy, x + dx
                valid = (nz >= 0) & (nz < D) & (ny >= 0) & (ny < H) & \
                        (nx >= 0) & (nx < W)
                nb = vol[b, jnp.clip(nz, 0, D - 1), jnp.clip(ny, 0, H - 1),
                         jnp.clip(nx, 0, W - 1)]
                nb = jnp.where(valid, nb, -1)
                f = jnp.where((nb >= 0)[:, None],
                              features[jnp.clip(nb, 0, N - 1)], 0.0)
                cols.append(f)
    a = jnp.concatenate(cols, axis=1)
    yv = a @ weight.reshape(27 * C_in, -1)
    yv = jnp.where(yv >= 0, yv, NEG_SLOPE * yv)
    mean = yv.mean(axis=0)
    var = ((yv - mean) ** 2).mean(axis=0)
    return (yv - mean) / jnp.sqrt(var + BN_EPS)


if __name__ == "__main__":
    B, D, H, W = 2, 16, 16, 16
    key = jax.random.PRNGKey(0)

    def make_case(k, C_in, C_out, N):
        k_coord, k_feat, k_w = jax.random.split(k, 3)
        flat = jax.random.choice(k_coord, B * D * H * W, shape=(N,),
                                 replace=False)
        bb = flat // (D * H * W)
        rem = flat % (D * H * W)
        zz = rem // (H * W)
        yy = (rem % (H * W)) // W
        xx = rem % W
        idx = jnp.stack([bb, zz, yy, xx], axis=1).astype(jnp.int32)
        feats = jax.random.normal(k_feat, (N, C_in), dtype=jnp.float32)
        # SubMConv3d weight: [k,k,k,C_in,C_out] flattened as [27, C_in, C_out]
        w = jax.random.normal(k_w, (27, C_in, C_out), dtype=jnp.float32) * 0.1
        return feats, idx, w

    k1, k2 = jax.random.split(key)
    cases = [
        (k1, 4, 32, 200),    # P=4 packing; bf16-intermediate path
        (k2, 4, 128, 160),   # P=1, Wp=128; recompute-in-normalize path
    ]
    for k, C_in, C_out, N in cases:
        features, indices, weight = make_case(k, C_in, C_out, N)
        out = conv_layer_forward(features, indices, weight, (D, H, W), B)
        out = jax.block_until_ready(out)
        ref = _reference(features, indices, weight, (D, H, W), B)
        assert out.shape == (N, C_out)
        # bf16 MXU inputs (+ bf16 intermediate on one path) vs full-f32 ref
        err = float(jnp.max(jnp.abs(out - ref)))
        assert err < 1e-1, (C_in, C_out, N, err)

    print("KERNEL_OK")
</pallas_src>

<mosaic_0001>
module attributes {stable_mosaic.version = 11 : i64} {
  func.func @conv_act_stats_store_kernel(%arg0: i32, %arg1: memref<8x512xbf16, #tpu.memory_space<vmem>>, %arg2: memref<512x128xbf16, #tpu.memory_space<vmem>>, %arg3: memref<8x128xbf16, #tpu.memory_space<vmem>>, %arg4: memref<8x128xf32, #tpu.memory_space<vmem>>, %arg5: memref<8x128xf32, #tpu.memory_space<vmem>>) attributes {dimension_semantics = [#tpu.dimension_semantics<arbitrary>], iteration_bounds = array<i64: 7>, scalar_prefetch = 0 : i64, scratch_operands = 0 : i64, tpu.core_type = #tpu.core_type<tc>, window_params = [{transform_indices = @transform_0, window_bounds = array<i64: 8, 512>}, {pipeline_mode = #tpu.pipeline_mode<synchronous>, transform_indices = @transform_1, window_bounds = array<i64: 512, 128>}, {transform_indices = @transform_2, window_bounds = array<i64: 8, 128>}, {pipeline_mode = #tpu.pipeline_mode<synchronous>, transform_indices = @transform_3, window_bounds = array<i64: 8, 128>}, {pipeline_mode = #tpu.pipeline_mode<synchronous>, transform_indices = @transform_4, window_bounds = array<i64: 8, 128>}]} {
    %c0_i32 = arith.constant 0 : i32
    %0 = arith.cmpi eq, %arg0, %c0_i32 : i32
    %1 = arith.extui %0 : i1 to i32
    %c0_i32_0 = arith.constant 0 : i32
    %2 = arith.cmpi ne, %1, %c0_i32_0 : i32
    scf.if %2 {
      %cst_18 = arith.constant 0.000000e+00 : f32
      %27 = vector.broadcast %cst_18 : f32 to vector<8x128xf32>
      %c0_19 = arith.constant 0 : index
      %c0_20 = arith.constant 0 : index
      %28 = vector.load %arg4[%c0_19, %c0_20] : memref<8x128xf32, #tpu.memory_space<vmem>>, vector<8x128xf32>
      tpu.vector_store %arg4[%c0_19, %c0_20], %27 {strides = array<i32>} : memref<8x128xf32, #tpu.memory_space<vmem>>, vector<8x128xf32>,
      %cst_21 = arith.constant 0.000000e+00 : f32
      %29 = vector.broadcast %cst_21 : f32 to vector<8x128xf32>
      %c0_22 = arith.constant 0 : index
      %c0_23 = arith.constant 0 : index
      %30 = vector.load %arg5[%c0_22, %c0_23] : memref<8x128xf32, #tpu.memory_space<vmem>>, vector<8x128xf32>
      tpu.vector_store %arg5[%c0_22, %c0_23], %29 {strides = array<i32>} : memref<8x128xf32, #tpu.memory_space<vmem>>, vector<8x128xf32>,
    } else {
    }
    %c0 = arith.constant 0 : index
    %c0_1 = arith.constant 0 : index
    %3 = vector.load %arg1[%c0, %c0_1] : memref<8x512xbf16, #tpu.memory_space<vmem>>, vector<8x512xbf16>
    %c0_2 = arith.constant 0 : index
    %c0_3 = arith.constant 0 : index
    %4 = vector.load %arg2[%c0_2, %c0_3] : memref<512x128xbf16, #tpu.memory_space<vmem>>, vector<512x128xbf16>
    %cst = arith.constant dense<0.000000e+00> : vector<8x128xf32>
    %5 = tpu.matmul %3, %4, %cst {dimension_numbers = #tpu.dot_dimension_numbers<[1], [0], [0], [1], [0, 0, 1, 1], [], []>} : vector<8x512xbf16>, vector<512x128xbf16>, vector<8x128xf32> -> vector<8x128xf32>
    %cst_4 = arith.constant 0.000000e+00 : f32
    %6 = vector.broadcast %cst_4 : f32 to vector<8x128xf32>
    %7 = arith.cmpf oge, %5, %6 : vector<8x128xf32>
    %cst_5 = arith.constant 0.00999999977 : f32
    %8 = vector.broadcast %cst_5 : f32 to vector<8x128xf32>
    %9 = arith.mulf %8, %5 : vector<8x128xf32>
    %10 = arith.select %7, %5, %9 : vector<8x128xi1>, vector<8x128xf32>
    %11 = arith.truncf %10 : vector<8x128xf32> to vector<8x128xbf16>
    %c0_6 = arith.constant 0 : index
    %c0_7 = arith.constant 0 : index
    %12 = vector.load %arg3[%c0_6, %c0_7] : memref<8x128xbf16, #tpu.memory_space<vmem>>, vector<8x128xbf16>
    tpu.vector_store %arg3[%c0_6, %c0_7], %11 {strides = array<i32>} : memref<8x128xbf16, #tpu.memory_space<vmem>>, vector<8x128xbf16>,
    %13 = arith.extf %11 : vector<8x128xbf16> to vector<8x128xf32>
    %c0_8 = arith.constant 0 : index
    %c0_9 = arith.constant 0 : index
    %14 = vector.load %arg4[%c0_8, %c0_9] : memref<8x128xf32, #tpu.memory_space<vmem>>, vector<8x128xf32>
    %cst_10 = arith.constant dense<0.000000e+00> : vector<128xf32>
    %15 = vector.multi_reduction <add>, %13, %cst_10 [0] : vector<8x128xf32> to vector<128xf32>
    %16 = vector.shape_cast %15 : vector<128xf32> to vector<1x128xf32>
    %17 = vector.broadcast %16 : vector<1x128xf32> to vector<8x128xf32>
    %18 = arith.addf %14, %17 : vector<8x128xf32>
    %c0_11 = arith.constant 0 : index
    %c0_12 = arith.constant 0 : index
    %19 = vector.load %arg4[%c0_11, %c0_12] : memref<8x128xf32, #tpu.memory_space<vmem>>, vector<8x128xf32>
    tpu.vector_store %arg4[%c0_11, %c0_12], %18 {strides = array<i32>} : memref<8x128xf32, #tpu.memory_space<vmem>>, vector<8x128xf32>,
    %c0_13 = arith.constant 0 : index
    %c0_14 = arith.constant 0 : index
    %20 = vector.load %arg5[%c0_13, %c0_14] : memref<8x128xf32, #tpu.memory_space<vmem>>, vector<8x128xf32>
    %21 = arith.mulf %13, %13 : vector<8x128xf32>
    %cst_15 = arith.constant dense<0.000000e+00> : vector<128xf32>
    %22 = vector.multi_reduction <add>, %21, %cst_15 [0] : vector<8x128xf32> to vector<128xf32>
    %23 = vector.shape_cast %22 : vector<128xf32> to vector<1x128xf32>
    %24 = vector.broadcast %23 : vector<1x128xf32> to vector<8x128xf32>
    %25 = arith.addf %20, %24 : vector<8x128xf32>
    %c0_16 = arith.constant 0 : index
    %c0_17 = arith.constant 0 : index
    %26 = vector.load %arg5[%c0_16, %c0_17] : memref<8x128xf32, #tpu.memory_space<vmem>>, vector<8x128xf32>
    tpu.vector_store %arg5[%c0_16, %c0_17], %25 {strides = array<i32>} : memref<8x128xf32, #tpu.memory_space<vmem>>, vector<8x128xf32>,
    return
  }
  func.func @transform_0(%arg0: i32) -> (i32, i32) {
    %c0_i32 = arith.constant 0 : i32
    %c0_i32_0 = arith.constant 0 : i32
    return %arg0, %c0_i32 : i32, i32
  }
  func.func @transform_1(%arg0: i32) -> (i32, i32) {
    %c0_i32 = arith.constant 0 : i32
    %c0_i32_0 = arith.constant 0 : i32
    %c0_i32_1 = arith.constant 0 : i32
    return %c0_i32, %c0_i32_0 : i32, i32
  }
  func.func @transform_2(%arg0: i32) -> (i32, i32) {
    %c0_i32 = arith.constant 0 : i32
    %c0_i32_0 = arith.constant 0 : i32
    return %arg0, %c0_i32 : i32, i32
  }
  func.func @transform_3(%arg0: i32) -> (i32, i32) {
    %c0_i32 = arith.constant 0 : i32
    %c0_i32_0 = arith.constant 0 : i32
    %c0_i32_1 = arith.constant 0 : i32
    return %c0_i32, %c0_i32_0 : i32, i32
  }
  func.func @transform_4(%arg0: i32) -> (i32, i32) {
    %c0_i32 = arith.constant 0 : i32
    %c0_i32_0 = arith.constant 0 : i32
    %c0_i32_1 = arith.constant 0 : i32
    return %c0_i32, %c0_i32_0 : i32, i32
  }
}

</mosaic_0001>

<bundles_post_ra>
// kernel: tpu_custom_call.1
= control target key start
LH: loop header
LB: loop body
LE: loop exit
PB: predicated region body
PF: predicated region fallthrough
CT: control target
= control target key end

     0   :  { %10 = vsyncpa [#allocation3], 0  ;;  %s1354_s0 = inlined_call_operand.hbm [shape: bf16[56,512], index: 0, kind: input, shape index: {}]   ;;  %s1355_s1 = inlined_call_operand.hbm [shape: bf16[512,128], index: 1, kind: input, shape index: {}]   ;;  %s1356_s2 = inlined_call_operand.hbm [shape: bf16[56,128], index: 2, kind: output, shape index: {0}]   ;;  %s1357_s3 = inlined_call_operand.hbm [shape: f32[8,128], index: 3, kind: output, shape index: {1}]   ;;  %s1358_s4 = inlined_call_operand.hbm [shape: f32[8,128], index: 4, kind: output, shape index: {2}]  }
   0x1   :  { %12 = vsyncpa [#allocation3 + $0x1], 0 }
   0x2   :  { %13 = vsyncpa [#allocation6], 0 }
   0x3   :  { %14 = vsyncpa [#allocation4], 0 }
   0x4   :  { %16 = vsyncpa [#allocation4 + $0x1], 0 }
   0x5   :  { %17 = vsyncpa [#allocation9], 0  ;;  %s1166_s15 = smov 0   ;;  %s1168_s16 = smov 0  }
   0x6   :  { %s1170_s17 = smov 0   ;;  %s1172_s18 = smov 0  }
   0x7 LB: > { %s1187_s19 = sadd.s32 4294967295, %s1131_s18   ;;  %s746_s20 = sadd.s32 4294967294, %s1131_s18   ;;  %s1131_s18 = sphi %s1172_s18, %s1386_s18   ;;  %s1127_s17 = sphi %s1170_s17, %s1385_s17   ;;  %s1123_s16 = sphi %s1168_s16, %s1384_s16   ;;  %s1119_s15 = sphi %s1166_s15, %s1383_s15  }
   0x8   : > { %p43_p0 = scmp.ne.s32.totalorder %s1123_s16, %s1119_s15  ;;  %p1359_p1 = scmp.eq.s32.totalorder %s1187_s19, 0 }
   0x9   : > { %p94_p3 = scmp.eq.s32.totalorder %s746_s20, 6  ;;  %p747_p5 = scmp.ge.s32.totalorder %s1131_s18, 1 }
   0xa   : > { %p1196_p4 = por %p1359_p1, %p43_p0  ;;  %p143_p7 = scmp.lt.s32.totalorder %s1131_s18, 8 }
   0xb   : > { %p1201_p6 = por %p94_p3, %p43_p0  ;;  %s1133_s24 = smov [#allocation5]  }
   0xc   : > { %s1363_s21 = scalar_select %p1196_p4, 1, 0 }
   0xd   : > { %s1364_s22 = scalar_select %p1201_p6, 1, 0 }
   0xe   : > { %p1207_p9 = pnand %p747_p5, %p143_p7  ;;  %s155_s25 = sshll.u32 %s1133_s24, 4  ;;  %s156_s25 = int_to_ptr.vmem [resolvable:$true] %s155_s25 }
   0xf   : > { %s1220_s27 = sadd.s32 1, %s1131_s18   ;;  %s30_s28 = sadd.s32 1, %s1127_s17 }
  0x10   : > { %s1365_s23 = scalar_select %p1207_p9, 1, 0 }
  0x11   : > { %p863_p10 = pneg %p1207_p9  ;;  %s27_s29 = ssub.s32 %s1131_s18, %s1220_s27 }
  0x12   : > { %s968_s30 = scalar_lea.vmem %s156_s25, 4096  ;;  %p976_p5 = scmp.lt.s32.totalorder %s156_s25, %s156_s25 }
  0x13   : > { %p1215_p11 = pnand %p863_p10, %p1359_p1  ;;  %p969_p13 = scmp.ne.s32.totalorder %s156_s25, %s968_s30 }
  0x14   : > { %p977_p7 = scmp.lt.s32.totalorder %s968_s30, %s968_s30 }
  0x15   : > { %p959_p12 = pneg %p1215_p11 }
  0x16   : > { %p978_p8 = por %p977_p7, %p976_p5 }
  0x17   : > { %p971_p0 = pnand %p969_p13, %p959_p12 }
  0x19   : > { %p972_p3 = pneg %p971_p0 }
  0x1b   : > { %p979_p2 = pnand %p978_p8, %p972_p3 }
  0x1d   : > { %982 = shalt.err (!%p979_p2)
}
  0x1e   : > { %s1134_s5 = smov 64   ;;  %s1135_s6 = smov 4  }
  0x1f   : > { %866 = dma.hbm_to_vmem [thread:$0]  (!%p1215_p11), %s1355_s1, 4096, %s156_s25, [#allocation6], %s1134_s5, %s1134_s5, %s1135_s6  }
  0x20   : > { %p28_p10 = scmp.eq.s32.totalorder %s27_s29, 0  ;;  %p37_p12 = scmp.ne.s32.totalorder %s1127_s17, %s1123_s16 }
  0x21   : > { %p38_p8 = scmp.eq.s32.totalorder %s1131_s18, 0  ;;  %p876_p2 = scmp.lt.s32.totalorder %s1131_s18, 7 }
  0x22   : > { %s1237_s9 = scalar_select %p28_p10, %s1127_s17, %s30_s28  }
  0x23   : > { %p39_p13 = por %p38_p8, %p37_p12  ;;  %p1367_p0 = scmp.eq.s32.totalorder %s1187_s19, 6 }
  0x24   : > { %s169_s11 = sand.u32 1, %s1127_s17   ;;  %s802_s12 = sshll.u32 %s1131_s18, 8 }
  0x25   : > { %p1241_p3 = por %p1367_p0, %p37_p12  ;;  %s750_s13 = sshll.u32 %s169_s11, 4 }
  0x26   : > { %s1250_s24 = scalar_lea.hbm %s1354_s0, %s802_s12  ;;  %s173_s25 = scalar_lea.vmem [#allocation2], %s750_s13 }
  0x27   : > { %s1368_s10 = scalar_select %p1241_p3, 1, 0 }
  0x28   : > { %s181_s26 = sshll.u32 %s173_s25, 4  ;;  %p1252_p11 = pnand %p876_p2, %p39_p13  ;;  %s182_s26 = int_to_ptr.vmem [resolvable:$true] %s181_s26 }
  0x29   : > { %s170_s29 = scalar_lea.sflag [#allocation3], %s169_s11  ;;  %s983_s30 = scalar_lea.hbm %s1250_s24, 256 }
  0x2a   : > { %p984_p5 = scmp.ne.s32.totalorder %s1250_s24, %s983_s30  ;;  %p985_p7 = pneg %p1252_p11 }
  0x2b   : > { %s988_s7 = scalar_lea.hbm %s1354_s0, 1792  ;;  %p989_p8 = scmp.lt.s32.totalorder %s1250_s24, %s1354_s0 }
  0x2c   : > { %p986_p10 = pnand %p985_p7, %p984_p5  ;;  %p990_p2 = scmp.lt.s32.totalorder %s988_s7, %s983_s30 }
  0x2e   : > { %p987_p12 = pneg %p986_p10  ;;  %p991_p13 = por %p990_p2, %p989_p8 }
  0x30   : > { %p992_p0 = pnand %p991_p13, %p987_p12 }
  0x32   : > { %995 = shalt.err (!%p992_p0)
}
  0x33   : > { %s996_s13 = scalar_lea.vmem %s182_s26, 256  ;;  %s1136_s11 = smov [#allocation2]  }
  0x34   : > { %p997_p1 = scmp.ne.s32.totalorder %s182_s26, %s996_s13  ;;  %s1001_s14 = sshll.u32 %s1136_s11, 4  ;;  %s1002_s14 = int_to_ptr.vmem [resolvable:$false] %s1001_s14 }
  0x35   : > { %s1003_s20 = scalar_lea.vmem %s1002_s14, 512  ;;  %p1004_p5 = scmp.lt.s32.totalorder %s182_s26, %s1002_s14 }
  0x36   : > { %p999_p6 = pnand %p997_p1, %p985_p7  ;;  %p1005_p10 = scmp.lt.s32.totalorder %s1003_s20, %s996_s13 }
  0x38   : > { %p1000_p3 = pneg %p999_p6  ;;  %p1006_p4 = por %p1005_p10, %p1004_p5 }
  0x3a   : > { %p1007_p9 = pnand %p1006_p4, %p1000_p3 }
  0x3c   : > { %1010 = shalt.err (!%p1007_p9)
}
  0x3d   : > { %870 = dma.hbm_to_vmem [thread:$0]  (!%p1252_p11), %s1250_s24, 256, %s182_s26, %s170_s29  }
  0x3e   : > { %p1370_p12 = scmp.ne.s32.totalorder %s1365_s23, 0 }
  0x3f   : > { %s1273_s25 = sand.u32 (!%p1370_p12), 1, %s1123_s16   ;;  %p1371_p1 = scmp.ne.s32.totalorder (!%p1370_p12), %s1363_s21, 0 }
  0x40   : > { %190 = sbr.rel (%p1370_p12) target bundleno = 367 (0x16f), region = 28  ;;  %s754_s30 = sshll.u32 (!%p1370_p12), %s1273_s25, 4 }
  0x41   : > { %s193_s5 = scalar_lea.sflag (!%p1370_p12), [#allocation3], %s1273_s25  ;;  %s1277_s6 = scalar_lea.vmem (!%p1370_p12), [#allocation2], %s754_s30 }
  0x45   : > { %1102 = dma.done.wait (%p1371_p1), %s193_s5, 256  }
  0x46   : > { %1104 = vsyncadd (%p1371_p1), %s193_s5, 4294967040  ;;  %p1372_p4 = scmp.eq.s32.totalorder %s1187_s19, 0 }
  0x48   : > { %1106 = dma.done.wait (%p1372_p4), [#allocation6], 4096   ;;  %p1373_p6 = pmov %p1372_p4 }
  0x49   : > { %s756_s23 = sshll.u32 %s1273_s25, 2  ;;  %p1374_p9 = scmp.ne.s32.totalorder %s1187_s19, 0 }
  0x4a   : > { %1108 = vsyncadd (%p1373_p6), [#allocation6], 4294963200  ;;  %s1288_s24 = scalar_lea.vmem [#allocation7], %s756_s23 }
  0x4b   : > { %229 = sbr.rel (%p1374_p9) target bundleno = 82 (0x52), region = 40 }
  0x50   : > { %v1137_v0 = vmov 0.0  }
  0x51   : > { %230 = vst [vmem:[#allocation8] sm:$0xff] %v1137_v0  ;;  %231 = vst [vmem:[#allocation10] sm:$0xff] %v1137_v0 }
  0x52 PF: > { %v921_v1 = vld [vmem:[#allocation5 + $0x78] sm:$0xff]   ;;  %v925_v5 = vld [vmem:[#allocation5 + $0x70] sm:$0xff]   ;;  %v929_v9 = vld [vmem:[#allocation5 + $0x68] sm:$0xff]   ;;  %s795_s21 = sshll.u32 %s1187_s19, 6  ;;  %s623_s26 = sshll.u32 %s1288_s24, 4  ;;  %s624_s26 = int_to_ptr.vmem [resolvable:$true] %s623_s26 }
  0x53   : > { %v922_v2 = vld [vmem:[#allocation5 + $0xf8] sm:$0xff]   ;;  %803 = vmatprep.subr.bf16.mxu0 %v921_v1  ;;  %v926_v6 = vld [vmem:[#allocation5 + $0xf0] sm:$0xff]   ;;  %v930_v10 = vld [vmem:[#allocation5 + $0xe8] sm:$0xff]   ;;  %s1299_s7 = scalar_lea.hbm %s1356_s2, %s795_s21  ;;  %s610_s8 = scalar_lea.sflag [#allocation4], %s1273_s25 }
  0x54   : > { %v923_v3 = vld [vmem:[#allocation5 + $0x38] sm:$0xff]   ;;  %825 = vmatprep.subr.bf16.mxu1 %v922_v2  ;;  %v927_v7 = vld [vmem:[#allocation5 + $0x30] sm:$0xff]   ;;  %v931_v11 = vld [vmem:[#allocation5 + $0x28] sm:$0xff]   ;;  %s1011_s12 = scalar_lea.vmem %s624_s26, 64  ;;  %p1375_p11 = scmp.ne.s32.totalorder %s1368_s10, 0 }
  0x55   : > { %v924_v4 = vld [vmem:[#allocation5 + $0xb8] sm:$0xff]   ;;  %804 = vmatpush3.bf16.msra.mxu0 %v923_v3  ;;  %v928_v8 = vld [vmem:[#allocation5 + $0xb0] sm:$0xff]   ;;  %v932_v12 = vld [vmem:[#allocation5 + $0xa8] sm:$0xff]   ;;  %p1012_p3 = scmp.ne.s32.totalorder %s624_s26, %s1011_s12  ;;  %s1138_s13 = smov [#allocation7]  }
  0x56   : > { %826 = vmatpush3.bf16.msra.mxu1 %v924_v4  ;;  %805 = vmatprep.subr.bf16.mxu0 %v925_v5  ;;  %v933_v13 = vld [vmem:[#allocation5 + $0x60] sm:$0xff]   ;;  %v937_v17 = vld [vmem:[#allocation5 + $0x58] sm:$0xff]   ;;  %v941_v21 = vld [vmem:[#allocation5 + $0x50] sm:$0xff]   ;;  %s1015_s11 = sshll.u32 %s1138_s13, 4  ;;  %s1016_s11 = int_to_ptr.vmem [resolvable:$false] %s1015_s11 }
  0x57   : > { %827 = vmatprep.subr.bf16.mxu1 %v926_v6  ;;  %v934_v14 = vld [vmem:[#allocation5 + $0xe0] sm:$0xff]   ;;  %v938_v18 = vld [vmem:[#allocation5 + $0xd8] sm:$0xff]   ;;  %v942_v22 = vld [vmem:[#allocation5 + $0xd0] sm:$0xff]   ;;  %p1013_p7 = pnand %p1012_p3, %p1375_p11  ;;  %s1017_s14 = scalar_lea.vmem %s1016_s11, 128 }
  0x58   : > { %v935_v15 = vld [vmem:[#allocation5 + $0x20] sm:$0xff]   ;;  %v939_v19 = vld [vmem:[#allocation5 + $0x18] sm:$0xff]   ;;  %v943_v23 = vld [vmem:[#allocation5 + $0x10] sm:$0xff]   ;;  %p1018_p2 = scmp.lt.s32.totalorder %s624_s26, %s1016_s11  ;;  %p1019_p13 = scmp.lt.s32.totalorder %s1017_s14, %s1011_s12 }
  0x59   : > { %806 = vmatpush3.bf16.msra.mxu0 %v927_v7  ;;  %v936_v16 = vld [vmem:[#allocation5 + $0xa0] sm:$0xff]   ;;  %v940_v20 = vld [vmem:[#allocation5 + $0x98] sm:$0xff]   ;;  %v944_v24 = vld [vmem:[#allocation5 + $0x90] sm:$0xff]   ;;  %p1014_p8 = pneg %p1013_p7 }
  0x5a   : > { %828 = vmatpush3.bf16.msra.mxu1 %v928_v8  ;;  %807 = vmatprep.subr.bf16.mxu0 %v929_v9  ;;  %v945_v25 = vld [vmem:[#allocation5 + $0x48] sm:$0xff]   ;;  %v949_v29 = vld [vmem:[#allocation5 + $0x40] sm:$0xff]   ;;  %p1020_p0 = por %p1019_p13, %p1018_p2 }
  0x5b   : > { %829 = vmatprep.subr.bf16.mxu1 %v930_v10  ;;  %v946_v26 = vld [vmem:[#allocation5 + $0xc8] sm:$0xff]   ;;  %v950_v30 = vld [vmem:[#allocation5 + $0xc0] sm:$0xff]  }
  0x5c   : > { %v947_v27 = vld [vmem:[#allocation5 + $0x8] sm:$0xff]   ;;  %v951_v31 = vld [vmem:[#allocation5] sm:$0xff]   ;;  %p1021_p5 = pnand %p1020_p0, %p1014_p8 }
  0x5d   : > { %808 = vmatpush3.bf16.msra.mxu0 %v931_v11  ;;  %v948_v28 = vld [vmem:[#allocation5 + $0x88] sm:$0xff]   ;;  %v952_v32 = vld [vmem:[#allocation5 + $0x80] sm:$0xff]  }
  0x5e   : > { %830 = vmatpush3.bf16.msra.mxu1 %v932_v12  ;;  %809 = vmatprep.subr.bf16.mxu0 %v933_v13  ;;  %v232_v33 = vld [vmem:[%s1277_s6] sm:$0xff]  ;;  %v233_v34 = vld [vmem:[%s1277_s6 + $0x8] sm:$0xff] }
  0x5f   : > { %831 = vmatprep.subr.bf16.mxu1 %v934_v14  ;;  %v758_v35 = vcombine.low %v232_v33, %v232_v33  ;;  %v759_v36 = vcombine.high %v232_v33, %v232_v33  ;;  %v760_v37 = vcombine.low %v233_v34, %v233_v34  ;;  %v761_v38 = vcombine.high %v233_v34, %v233_v34 }
  0x61   : > { %810 = vmatpush3.bf16.msra.mxu0 %v935_v15  ;;  %536 = vmatprep.mubr.bf16.mxu0 %v759_v36 }
  0x62   : > { %832 = vmatpush3.bf16.msra.mxu1 %v936_v16  ;;  %811 = vmatprep.subr.bf16.mxu0 %v937_v17 }
  0x63   : > { %833 = vmatprep.subr.bf16.mxu1 %v938_v18  ;;  %576 = vmatprep.mubr.bf16.mxu1 %v761_v38 }
  0x65   : > { %812 = vmatpush3.bf16.msra.mxu0 %v939_v19 }
  0x66   : > { %834 = vmatpush3.bf16.msra.mxu1 %v940_v20  ;;  %813 = vmatprep.subr.bf16.mxu0 %v941_v21 }
  0x67   : > { %835 = vmatprep.subr.bf16.mxu1 %v942_v22 }
  0x69   : > { %814 = vmatpush3.bf16.msra.mxu0 %v943_v23 }
  0x6a   : > { %836 = vmatpush3.bf16.msra.mxu1 %v944_v24  ;;  %815 = vmatprep.subr.bf16.mxu0 %v945_v25 }
  0x6b   : > { %837 = vmatprep.subr.bf16.mxu1 %v946_v26 }
  0x6d   : > { %816 = vmatpush3.bf16.msra.mxu0 %v947_v27 }
  0x6e   : > { %838 = vmatpush3.bf16.msra.mxu1 %v948_v28  ;;  %817 = vmatprep.subr.bf16.mxu0 %v949_v29 }
  0x6f   : > { %839 = vmatprep.subr.bf16.mxu1 %v950_v30 }
  0x71   : > { %818 = vmatpush3.bf16.msra.mxu0 %v951_v31 }
  0x72   : > { %840 = vmatpush3.bf16.msra.mxu1 %v952_v32 }
  0x74   : > { %537 = vmatmul.mubr.bf16.vlgmr.msra.gmra.mxu0 %v758_v35 }
  0x75   : > { %577 = vmatmul.mubr.bf16.vlgmr.msra.gmra.mxu1 %v760_v37 }
 0x134   : > { %v819_v39 = vpop.f32.mrf.mxu0 }
 0x135   : > { %v841_v40 = vpop.f32.mrf.mxu1 }
 0x136   : > { %v820_v41 = vpop.f32.mrf.mxu0 }
 0x137   : > { %v842_v42 = vpop.f32.mrf.mxu1  ;;  %v821_v43 = vadd.f32 %v820_v41, %v819_v39 }
 0x138   : > { %v843_v44 = vadd.f32 %v842_v42, %v841_v40  ;;  %v822_v45 = vpop.f32.mrf.mxu0 }
 0x139   : > { %v844_v46 = vpop.f32.mrf.mxu1 }
 0x13a   : > { %v579_v47 = vadd.f32 %v843_v44, %v821_v43  ;;  %v823_v48 = vpop.f32.mrf.mxu0 }
 0x13b   : > { %v845_v49 = vpop.f32.mrf.mxu1 }
 0x13c   : > { %vm584_vm0 = vcmp.ge.f32.partialorder %v579_v47, 0.0  ;;  %v585_v50 = vmul.f32 0.01, %v579_v47 }
 0x13e   : > { %v586_v51 = vsel %vm584_vm0, %v579_v47, %v585_v50 }
 0x13f   : > { %v587_v52 = vpack.c.bf16 %v586_v51, %v586_v51 }
 0x141   : > { %v589_v53 = vunpack.c.l.bf16 %v587_v52  ;;  %588 = vst [vmem:[%s1288_s24] sm:$0xf] %v587_v52 }
 0x142   : > { %1024 = shalt.err (!%p1021_p5)
}
 0x143   : > { %s1025_s20 = scalar_lea.hbm %s1299_s7, 64  ;;  %s1029_s5 = scalar_lea.hbm %s1356_s2, 448 }
 0x144   : > { %p1026_p10 = scmp.ne.s32.totalorder %s1299_s7, %s1025_s20  ;;  %p1030_p4 = scmp.lt.s32.totalorder %s1299_s7, %s1356_s2 }
 0x145   : > { %p1031_p6 = scmp.lt.s32.totalorder %s1029_s5, %s1025_s20 }
 0x146   : > { %p1027_p12 = pnand %p1026_p10, %p1375_p11 }
 0x147   : > { %p1032_p9 = por %p1031_p6, %p1030_p4 }
 0x148   : > { %p1028_p1 = pneg %p1027_p12 }
 0x14a   : > { %p1033_p3 = pnand %p1032_p9, %p1028_p1 }
 0x14c   : > { %1036 = shalt.err (!%p1033_p3)
}
 0x14d   : > { %853 = dma.vmem_to_hbm [thread:$0]  (%p1375_p11), %s624_s26, 64, %s1299_s7, %s610_s8   ;;  %v591_v54 = vrot.slane %v589_v53, 4  ;;  %v600_v55 = vmul.f32 %v589_v53, %v589_v53  ;;  %v590_v0 = vld [vmem:[#allocation8] sm:$0xff]  ;;  %v599_v3 = vld [vmem:[#allocation10] sm:$0xff] }
 0x14e   : > { %s1139_s24 = smov [#allocation8]   ;;  %s1140_s10 = smov [#allocation10]  }
 0x14f   : > { %v592_v56 = vadd.f32 %v591_v54, %v589_v53  ;;  %v601_v57 = vrot.slane %v600_v55, 4  ;;  %s634_s21 = sshll.u32 %s1139_s24, 4  ;;  %s645_s28 = sshll.u32 %s1140_s10, 4  ;;  %s635_s21 = int_to_ptr.vmem [resolvable:$true] %s634_s21  ;;  %s646_s28 = int_to_ptr.vmem [resolvable:$true] %s645_s28 }
 0x150   : > { %s1037_s26 = scalar_lea.vmem %s635_s21, 128  ;;  %p1376_p7 = scmp.eq.s32.totalorder %s1187_s19, 6 }
 0x151   : > { %v593_v58 = vrot.slane %v592_v56, 2  ;;  %v602_v59 = vadd.f32 %v601_v57, %v600_v55  ;;  %p1038_p11 = scmp.ne.s32.totalorder %s635_s21, %s1037_s26  ;;  %p1044_p13 = scmp.lt.s32.totalorder %s635_s21, %s635_s21 }
 0x152   : > { %p1045_p0 = scmp.lt.s32.totalorder %s1037_s26, %s1037_s26 }
 0x153   : > { %v594_v60 = vadd.f32 %v593_v58, %v592_v56  ;;  %v603_v61 = vrot.slane %v602_v59, 2  ;;  %p1039_p8 = pnand %p1038_p11, %p1376_p7 }
 0x154   : > { %p1046_p5 = por %p1045_p0, %p1044_p13 }
 0x155   : > { %v595_v62 = vrot.slane %v594_v60, 1  ;;  %v604_v63 = vadd.f32 %v603_v61, %v602_v59  ;;  %p1040_p2 = pneg %p1039_p8 }
 0x157   : > { %v596_v1 = vadd.f32 %v595_v62, %v594_v60  ;;  %v605_v2 = vrot.slane %v604_v63, 1  ;;  %p1047_p10 = pnand %p1046_p5, %p1040_p2 }
 0x159   : > { %v597_v4 = vadd.f32 %v596_v1, %v590_v0  ;;  %v606_v5 = vadd.f32 %v605_v2, %v604_v63 }
 0x15b   : > { %598 = vst [vmem:[#allocation8] sm:$0xff] %v597_v4  ;;  %v607_v6 = vadd.f32 %v606_v5, %v599_v3 }
 0x15c   : > { %1050 = shalt.err (!%p1047_p10)
}
 0x15d   : > { %p1377_p12 = pmov %p1376_p7  ;;  %608 = vst [vmem:[#allocation10] sm:$0xff] %v607_v6  ;;  %s1061_s8 = scalar_lea.vmem %s646_s28, 128 }
 0x15e   : > { %p1062_p1 = scmp.ne.s32.totalorder %s646_s28, %s1061_s8  ;;  %p1378_p4 = pmov %p1376_p7 }
 0x15f   : > { %855 = dma.vmem_to_hbm [thread:$0]  (%p1377_p12), %s635_s21, 128, %s1357_s3, [#allocation9]  }
 0x160   : > { %p1063_p6 = pnand %p1062_p1, %p1378_p4  ;;  %p1068_p3 = scmp.lt.s32.totalorder %s646_s28, %s646_s28 }
 0x161   : > { %p1069_p11 = scmp.lt.s32.totalorder %s1061_s8, %s1061_s8 }
 0x162   : > { %p1064_p9 = pneg %p1063_p6 }
 0x163   : > { %p1070_p7 = por %p1069_p11, %p1068_p3 }
 0x165   : > { %p1071_p8 = pnand %p1070_p7, %p1064_p9 }
 0x167   : > { %1074 = shalt.err (!%p1071_p8)
}
 0x168   : > { %p1379_p2 = pmov %p1378_p4 }
 0x16a   : > { %857 = dma.vmem_to_hbm [thread:$0]  (%p1379_p2), %s646_s28, 128, %s1358_s4, [#allocation9]  }
 0x16b   : > { %p1380_p13 = pmov %p1379_p2 }
 0x16c   : > { %p1381_p0 = pmov %p1379_p2 }
 0x16d   : > { %1110 = dma.done.wait (%p1380_p13), [#allocation9], 256  }
 0x16e   : > { %1112 = vsyncadd (%p1381_p0), [#allocation9], 4294967040 }
 0x16f PF: > { %p882_p5 = scmp.ge.s32.totalorder %s1131_s18, 2  ;;  %s665_s11 = sand.u32 1, %s1119_s15  }
 0x170   : > { %p1382_p10 = scmp.ne.s32.totalorder %s1364_s22, 0  ;;  %s666_s14 = scalar_lea.sflag [#allocation4], %s665_s11 }
 0x172   : > { %p872_p12 = pnand %p882_p5, %p1382_p10 }
 0x174   : > { %p873_p1 = pneg %p872_p12 }
 0x176   : > { %1114 = dma.done.wait (%p873_p1), %s666_s14, 64  }
 0x177   : > { %1116 = vsyncadd (%p873_p1), %s666_s14, 4294967232  ;;  %p20_p4 = scmp.ge.s32.totalorder %s1220_s27, 9   ;;  %s1383_s15 = smov %s1123_s16 }
 0x178   : > { %s1384_s16 = smov %s1127_s17  ;;  %s1385_s17 = smov %s1237_s9 }
 0x179   : > { %s1386_s18 = smov %s1220_s27  ;;  %22 = sbr.rel (!%p20_p4) target bundleno = 7 (0x7), region = 97 }
 0x17e   :  { %671 = vsyncpa [#allocation3], 1 }
 0x17f   :  { %673 = vsyncpa [#allocation3 + $0x1], 1 }
 0x180   :  { %674 = vsyncpa [#allocation6], 1 }
 0x181   :  { %675 = vsyncpa [#allocation4], 1 }
 0x182   :  { %677 = vsyncpa [#allocation4 + $0x1], 1 }
 0x183   :  { %678 = vsyncpa [#allocation9], 1 }

</bundles_post_ra>
